<compile_context>
chip_gen: v5e
topology: v5e:2x2
jax: 0.10.0
libtpu: 0.0.40
codegen_flags: <defaults>
</compile_context>

<pallas_src>
import jax
import jax.numpy as jnp
from jax.experimental import pallas as pl
from jax.experimental.pallas import tpu as pltpu


def _copy_kernel(x_ref, o_ref):
    # Pure pass-through: copy the current VMEM tile to the output tile.
    o_ref[...] = x_ref[...]


def _pick_tile_rows(rows, max_tile_rows):
    """Largest block row-count: the whole array if it is small, otherwise the
    biggest divisor of `rows` that is a multiple of 8 and <= max_tile_rows
    (respects the (8,128) block-shape constraint)."""
    if rows <= max_tile_rows:
        return rows
    t = max_tile_rows - (max_tile_rows % 8)
    while t >= 8:
        if rows % t == 0:
            return t
        t -= 8
    return rows  # fallback: single block covering everything


def pallas_identity(x2d, *, max_tile_rows=1024, alias_input=True):
    """Tiled identity over a lane-dense 2D (rows, 128*k) array.

    - Caller supplies a last dim that is a multiple of 128 (lane-dense =>
      unmasked vst; matters most on v5e's single store slot).  No padding.
    - Biggest tile that fits: ~0.35 us fixed overhead per grid step, and
      512-1024 row tiles reach ~85% of the HBM roofline on v6e, so small
      copies collapse to grid=(1,) while large inputs keep multiple
      "parallel" blocks for v7x's 2 TensorCores.
    - Per-tile bytes capped at ~8 MiB so double-buffered input + output
      (4x tile resident) fits v7x's 64 MiB physical / 32 MiB scoped VMEM.
    - input_output_aliases={0: 0}: output aliases the input buffer.
    """
    R, C = x2d.shape
    assert C % 128 == 0, "last dim must be lane-dense (multiple of 128)"
    itemsize = jnp.dtype(x2d.dtype).itemsize
    cap_rows = max(8, (8 * 1024 * 1024) // (C * itemsize))
    tile_rows = _pick_tile_rows(R, min(max_tile_rows, cap_rows))
    assert R % tile_rows == 0
    grid = (R // tile_rows,)

    return pl.pallas_call(
        _copy_kernel,
        out_shape=jax.ShapeDtypeStruct((R, C), x2d.dtype),
        grid_spec=pl.GridSpec(
            grid=grid,
            in_specs=[pl.BlockSpec((tile_rows, C), lambda i: (i, 0))],
            out_specs=pl.BlockSpec((tile_rows, C), lambda i: (i, 0)),
        ),
        input_output_aliases={0: 0} if alias_input else {},
        compiler_params=pltpu.CompilerParams(
            dimension_semantics=("parallel",)),
    )(x2d)


class Recognizer:
    """JAX equivalent of models/FOTS.py::Recognizer.

    The original module defines no parameters and its forward returns None.
    """

    def __init__(self):
        # nn.Module.__init__ creates no parameters for Recognizer.
        pass

    def forward(self, *inputs):
        # Exact semantics of the PyTorch module: ignore inputs, return None.
        return None

    __call__ = forward


if __name__ == "__main__":
    key = jax.random.PRNGKey(0)
    # Small NCHW input consistent with a FOTS-style feature map.
    x = jax.random.normal(key, (2, 4, 16, 16), dtype=jnp.float32)

    # 1) Exercise the Pallas kernel path (identity pass-through smoke test).
    #    2*4*16*16 = 2048 elems -> padding-free lane-dense (16, 128) slab.
    B, C, H, W = x.shape
    total = B * C * H * W
    rows = total // 128                    # 16
    x2d = x.reshape(rows, 128)
    y2d = pallas_identity(x2d)
    y2d = jax.block_until_ready(y2d)
    # Sanity: kernel is an exact copy (compare against a fresh reshape of x).
    assert y2d.shape == (rows, 128)
    assert bool(jnp.all(y2d == x.reshape(rows, 128)))

    # 2) Run the Recognizer forward — returns None by specification.
    #    (The Pallas result above is a smoke test only; Recognizer does not
    #    consume it.)
    model = Recognizer()
    out = model(x)
    assert out is None

    print("KERNEL_OK")
</pallas_src>

<mosaic_0001>
module attributes {stable_mosaic.version = 11 : i64} {
  func.func @_copy_kernel(%arg0: i32, %arg1: memref<16x128xf32, #tpu.memory_space<vmem>>, %arg2: memref<16x128xf32, #tpu.memory_space<vmem>>) attributes {dimension_semantics = [#tpu.dimension_semantics<parallel>], iteration_bounds = array<i64: 1>, scalar_prefetch = 0 : i64, scratch_operands = 0 : i64, tpu.core_type = #tpu.core_type<tc>, window_params = [{transform_indices = @transform_0, window_bounds = array<i64: 16, 128>}, {transform_indices = @transform_1, window_bounds = array<i64: 16, 128>}]} {
    %c0 = arith.constant 0 : index
    %c0_0 = arith.constant 0 : index
    %0 = vector.load %arg1[%c0, %c0_0] : memref<16x128xf32, #tpu.memory_space<vmem>>, vector<16x128xf32>
    %c0_1 = arith.constant 0 : index
    %c0_2 = arith.constant 0 : index
    %1 = vector.load %arg2[%c0_1, %c0_2] : memref<16x128xf32, #tpu.memory_space<vmem>>, vector<16x128xf32>
    tpu.vector_store %arg2[%c0_1, %c0_2], %0 {strides = array<i32>} : memref<16x128xf32, #tpu.memory_space<vmem>>, vector<16x128xf32>,
    return
  }
  func.func @transform_0(%arg0: i32) -> (i32, i32) {
    %c0_i32 = arith.constant 0 : i32
    %c0_i32_0 = arith.constant 0 : i32
    return %arg0, %c0_i32 : i32, i32
  }
  func.func @transform_1(%arg0: i32) -> (i32, i32) {
    %c0_i32 = arith.constant 0 : i32
    %c0_i32_0 = arith.constant 0 : i32
    return %arg0, %c0_i32 : i32, i32
  }
}

</mosaic_0001>

<bundles_post_ra>
// kernel: tpu_custom_call.1
= control target key start
LH: loop header
LB: loop body
LE: loop exit
PB: predicated region body
PF: predicated region fallthrough
CT: control target
= control target key end

     0   :  { %6 = vsyncpa [#allocation3], 0  ;;  %s124_s0 = inlined_call_operand.hbm [shape: f32[16,128], index: 0, kind: input, shape index: {}, may-alias: {0,1}]   ;;  %s125_s1 = inlined_call_operand.hbm [shape: f32[16,128], index: 1, kind: output, shape index: {}, may-alias: {0,1}]  }
   0x1   :  { %7 = vsyncpa [#allocation4], 0  ;;  %s12_s8 = sshll.u32 %s124_s0, 4  ;;  %s104_s9 = smov [#allocation2]   ;;  %s13_s8 = int_to_ptr.hbm [resolvable:$true] %s12_s8 }
   0x2   :  { %s14_s10 = sshll.u32 %s104_s9, 4  ;;  %s105_s11 = smov 128   ;;  %s15_s10 = int_to_ptr.vmem [resolvable:$true] %s14_s10 }
   0x3   :  { %s106_s12 = smov 8  }
   0x4   :  { %20 = dma.hbm_to_vmem [thread:$0]  %s13_s8, 256, %s15_s10, [#allocation3], %s105_s11, %s105_s11, %s106_s12  }
   0x5   :  { %100 = dma.done.wait [#allocation3], 256  }
   0x6   :  { %101 = vsyncadd [#allocation3], 4294967040  ;;  %s107_s13 = smov [#allocation5]   ;;  %s35_s17 = sshll.u32 %s125_s1, 4  ;;  %v25_v0 = vld [vmem:[#allocation2] sm:$0xff]  ;;  %v26_v1 = vld [vmem:[#allocation2 + $0x8] sm:$0xff]  ;;  %s36_s17 = int_to_ptr.hbm [resolvable:$true] %s35_s17 }
   0x7   :  { %s33_s14 = sshll.u32 %s107_s13, 4  ;;  %27 = vst [vmem:[#allocation5] sm:$0xff] %v25_v0  ;;  %s34_s14 = int_to_ptr.vmem [resolvable:$true] %s33_s14 }
   0x8   :  { %28 = vst [vmem:[#allocation5 + $0x8] sm:$0xff] %v26_v1 }
   0x9   :  { %41 = dma.vmem_to_hbm [thread:$0]  %s34_s14, 256, %s36_s17, [#allocation4], %s105_s11, %s105_s11, %s106_s12  }
   0xa   :  { %102 = dma.done.wait [#allocation4], 256  }
   0xb   :  { %103 = vsyncadd [#allocation4], 4294967040 }
   0xc   :  { %46 = vsyncpa [#allocation3], 1 }
   0xd   :  { %47 = vsyncpa [#allocation4], 1 }

</bundles_post_ra>
